<compile_context>
chip_gen: v5e
topology: v5e:2x2
jax: 0.10.0
libtpu: 0.0.40
codegen_flags: <defaults>
</compile_context>

<pallas_src>
import functools

import jax
import jax.numpy as jnp
from jax.experimental import pallas as pl
from jax.experimental.pallas import tpu as pltpu

LN_EPS = 1e-5  # PyTorch nn.LayerNorm default


def _round_up(v, m):
    return ((v + m - 1) // m) * m


def _prenorm_linear_kernel(x_ref, gamma_ref, beta_ref, w_ref, b_ref, o_ref):
    # x_ref: (TM, D)   gamma/beta: (1, D) f32   w: (D, TN)   b: (1, TN) f32
    # o_ref: (TM, TN)
    x = x_ref[...].astype(jnp.float32)

    # --- LayerNorm over last axis (the compute PreNorm itself owns) ---
    mean = jnp.mean(x, axis=-1, keepdims=True)
    centered = x - mean
    var = jnp.mean(centered * centered, axis=-1, keepdims=True)
    y = centered * jax.lax.rsqrt(var + LN_EPS)
    y = y * gamma_ref[...] + beta_ref[...]          # params already f32

    # --- fn(...) : representative Linear(D -> H) slice on the MXU ---
    # Feed the MXU in the weight's native dtype (bf16 in production) and
    # accumulate in f32; no per-step f32 upcast of the weight tile.
    y = y.astype(w_ref.dtype)
    out = jnp.dot(y, w_ref[...], preferred_element_type=jnp.float32)
    out = out + b_ref[...]

    o_ref[...] = out.astype(o_ref.dtype)


@functools.partial(jax.jit, static_argnames=("block_rows", "block_cols"))
def prenorm(x, gamma, beta, w, b, *, block_rows=256, block_cols=256):
    """fn(LayerNorm(x)) with fn = Linear(D -> H), fused in one Pallas kernel.

    x: (B, N, D); gamma, beta: (D,); w: (D, H); b: (H,)  ->  (B, N, H)

    block_rows: row tile (sweep 256-1024 subject to VMEM; multiple of 16 so
                bf16 activations keep (16,128) packing).
    block_cols: H tile, multiple of 128 (128 on v5e, 256 on v6e/v7x).
    """
    B, N, D = x.shape
    H = w.shape[1]
    M = B * N
    out_dtype = x.dtype

    # ---- tile sizing (per-generation knobs are the defaults above) ----
    row_align = 16 if x.dtype == jnp.bfloat16 else 8
    tm = min(block_rows, _round_up(M, row_align))
    tm = _round_up(tm, row_align)

    if H % 128 == 0 and H >= block_cols and block_cols % 128 == 0:
        tn = block_cols
    elif H % 128 == 0:
        tn = H if H <= block_cols else block_cols
    else:
        tn = H  # ragged H: take the whole axis (still lane-dense if H >= 128)
    if H % tn != 0:
        tn = H

    # ---- pad rows so the grid is exact (padded rows are discarded at the end;
    #      zero rows are numerically safe: var + eps > 0) ----
    M_pad = _round_up(M, tm)
    x2 = x.reshape(M, D)
    if M_pad != M:
        x2 = jnp.pad(x2, ((0, M_pad - M), (0, 0)))

    # One-time parameter prep (hoisted out of the kernel).
    gamma2 = gamma.reshape(1, D).astype(jnp.float32)
    beta2 = beta.reshape(1, D).astype(jnp.float32)
    b2 = b.reshape(1, H).astype(jnp.float32)

    grid = (M_pad // tm, H // tn)

    # ---- VMEM budget: double-buffered tiles + small headroom, capped so the
    #      same request is safe on v7x (64 MiB physical). ----
    est = 2 * (
        tm * D * x2.dtype.itemsize
        + D * tn * w.dtype.itemsize
        + tn * 4
        + tm * tn * jnp.dtype(out_dtype).itemsize
    ) + 2 * (2 * D * 4)
    vmem_limit = int(min(56 * 2**20, max(32 * 2**20, 2 * est)))

    out = pl.pallas_call(
        _prenorm_linear_kernel,
        out_shape=jax.ShapeDtypeStruct((M_pad, H), out_dtype),
        grid=grid,
        in_specs=[
            pl.BlockSpec((tm, D), lambda i, j: (i, 0)),   # x rows (full D: LN reduction)
            pl.BlockSpec((1, D), lambda i, j: (0, 0)),    # gamma (f32)
            pl.BlockSpec((1, D), lambda i, j: (0, 0)),    # beta  (f32)
            pl.BlockSpec((D, tn), lambda i, j: (0, j)),   # fn weight, H-tiled
            pl.BlockSpec((1, tn), lambda i, j: (0, j)),   # fn bias,   H-tiled (f32)
        ],
        out_specs=pl.BlockSpec((tm, tn), lambda i, j: (i, j)),
        compiler_params=pltpu.CompilerParams(
            dimension_semantics=("parallel", "parallel"),
            vmem_limit_bytes=vmem_limit,
        ),
    )(x2, gamma2, beta2, w, b2)

    # TODO(synk): for very large D where the (tm, D) x-tile + (D, tn) weight tile
    # exceed the per-generation VMEM budget, add a K grid axis over D with an f32
    # VMEM accumulator (pl.when init / finalize), keeping that axis last and
    # "arbitrary".  LayerNorm's full-D reduction would then need a two-pass or
    # Welford-style split, so it is not done here.

    out = out[:M]
    return out.reshape(B, N, H)


def _reference(x, gamma, beta, w, b):
    xf = x.astype(jnp.float32)
    mean = jnp.mean(xf, axis=-1, keepdims=True)
    var = jnp.mean((xf - mean) ** 2, axis=-1, keepdims=True)
    y = (xf - mean) / jnp.sqrt(var + LN_EPS) * gamma.astype(jnp.float32) + beta.astype(jnp.float32)
    y = y.astype(w.dtype)
    out = jnp.dot(y, w, preferred_element_type=jnp.float32) + b.astype(jnp.float32)
    return out.astype(x.dtype)


if __name__ == "__main__":
    # Small but lane-dense demo shapes (D, H multiples of 128 so the test
    # exercises the same unmasked layouts as production ViT sizes).
    B, N, D, H = 2, 8, 128, 256  # batch, tokens, dim, hidden of fn

    key = jax.random.PRNGKey(0)
    kx, kw, kb = jax.random.split(key, 3)

    x = jax.random.normal(kx, (B, N, D), dtype=jnp.float32)

    # nn.LayerNorm(dim) params: weight=1, bias=0 (PyTorch default init)
    gamma = jnp.ones((D,), dtype=jnp.float32)
    beta = jnp.zeros((D,), dtype=jnp.float32)

    # fn = Linear(D, H) params, deterministic synthetic init
    w = jax.random.normal(kw, (D, H), dtype=jnp.float32) * 0.02
    b = jax.random.normal(kb, (H,), dtype=jnp.float32) * 0.02

    out = prenorm(x, gamma, beta, w, b)
    out = jax.block_until_ready(out)

    ref = _reference(x, gamma, beta, w, b)
    assert out.shape == (B, N, H), out.shape
    assert jnp.allclose(out, ref, atol=1e-4, rtol=1e-4), \
        float(jnp.max(jnp.abs(out - ref)))

    print("KERNEL_OK")
</pallas_src>

<mosaic_0001>
module attributes {stable_mosaic.version = 11 : i64} {
  func.func @_prenorm_linear_kernel(%arg0: i32, %arg1: i32, %arg2: memref<16x128xf32, #tpu.memory_space<vmem>>, %arg3: memref<1x128xf32, #tpu.memory_space<vmem>>, %arg4: memref<1x128xf32, #tpu.memory_space<vmem>>, %arg5: memref<128x256xf32, #tpu.memory_space<vmem>>, %arg6: memref<1x256xf32, #tpu.memory_space<vmem>>, %arg7: memref<16x256xf32, #tpu.memory_space<vmem>>) attributes {dimension_semantics = [#tpu.dimension_semantics<parallel>, #tpu.dimension_semantics<parallel>], iteration_bounds = array<i64: 1, 1>, scalar_prefetch = 0 : i64, scratch_operands = 0 : i64, tpu.core_type = #tpu.core_type<tc>, window_params = [{transform_indices = @transform_0, window_bounds = array<i64: 16, 128>}, {pipeline_mode = #tpu.pipeline_mode<synchronous>, transform_indices = @transform_1, window_bounds = array<i64: 1, 128>}, {pipeline_mode = #tpu.pipeline_mode<synchronous>, transform_indices = @transform_2, window_bounds = array<i64: 1, 128>}, {transform_indices = @transform_3, window_bounds = array<i64: 128, 256>}, {transform_indices = @transform_4, window_bounds = array<i64: 1, 256>}, {transform_indices = @transform_5, window_bounds = array<i64: 16, 256>}]} {
    %c0 = arith.constant 0 : index
    %c0_0 = arith.constant 0 : index
    %0 = vector.load %arg2[%c0, %c0_0] : memref<16x128xf32, #tpu.memory_space<vmem>>, vector<16x128xf32>
    %cst = arith.constant dense<0.000000e+00> : vector<16xf32>
    %1 = vector.multi_reduction <add>, %0, %cst [1] : vector<16x128xf32> to vector<16xf32>
    %2 = vector.shape_cast %1 : vector<16xf32> to vector<16x1xf32>
    %cst_1 = arith.constant 1.280000e+02 : f32
    %3 = vector.broadcast %cst_1 : f32 to vector<16x1xf32>
    %4 = arith.divf %2, %3 : vector<16x1xf32>
    %5 = vector.broadcast %4 : vector<16x1xf32> to vector<16x128xf32>
    %6 = arith.subf %0, %5 : vector<16x128xf32>
    %7 = arith.mulf %6, %6 : vector<16x128xf32>
    %cst_2 = arith.constant dense<0.000000e+00> : vector<16xf32>
    %8 = vector.multi_reduction <add>, %7, %cst_2 [1] : vector<16x128xf32> to vector<16xf32>
    %9 = vector.shape_cast %8 : vector<16xf32> to vector<16x1xf32>
    %cst_3 = arith.constant 1.280000e+02 : f32
    %10 = vector.broadcast %cst_3 : f32 to vector<16x1xf32>
    %11 = arith.divf %9, %10 : vector<16x1xf32>
    %cst_4 = arith.constant 9.99999974E-6 : f32
    %12 = vector.broadcast %cst_4 : f32 to vector<16x1xf32>
    %13 = arith.addf %11, %12 : vector<16x1xf32>
    %14 = math.rsqrt %13 : vector<16x1xf32>
    %15 = vector.broadcast %14 : vector<16x1xf32> to vector<16x128xf32>
    %16 = arith.mulf %6, %15 : vector<16x128xf32>
    %c0_5 = arith.constant 0 : index
    %c0_6 = arith.constant 0 : index
    %17 = vector.load %arg3[%c0_5, %c0_6] : memref<1x128xf32, #tpu.memory_space<vmem>>, vector<1x128xf32>
    %18 = vector.broadcast %17 : vector<1x128xf32> to vector<16x128xf32>
    %19 = arith.mulf %16, %18 : vector<16x128xf32>
    %c0_7 = arith.constant 0 : index
    %c0_8 = arith.constant 0 : index
    %20 = vector.load %arg4[%c0_7, %c0_8] : memref<1x128xf32, #tpu.memory_space<vmem>>, vector<1x128xf32>
    %21 = vector.broadcast %20 : vector<1x128xf32> to vector<16x128xf32>
    %22 = arith.addf %19, %21 : vector<16x128xf32>
    %c0_9 = arith.constant 0 : index
    %c0_10 = arith.constant 0 : index
    %23 = vector.load %arg5[%c0_9, %c0_10] : memref<128x256xf32, #tpu.memory_space<vmem>>, vector<128x256xf32>
    %cst_11 = arith.constant dense<0.000000e+00> : vector<16x256xf32>
    %24 = tpu.matmul %22, %23, %cst_11 {dimension_numbers = #tpu.dot_dimension_numbers<[1], [0], [0], [1], [0, 0, 1, 1], [], []>} : vector<16x128xf32>, vector<128x256xf32>, vector<16x256xf32> -> vector<16x256xf32>
    %c0_12 = arith.constant 0 : index
    %c0_13 = arith.constant 0 : index
    %25 = vector.load %arg6[%c0_12, %c0_13] : memref<1x256xf32, #tpu.memory_space<vmem>>, vector<1x256xf32>
    %26 = vector.broadcast %25 : vector<1x256xf32> to vector<16x256xf32>
    %27 = arith.addf %24, %26 : vector<16x256xf32>
    %c0_14 = arith.constant 0 : index
    %c0_15 = arith.constant 0 : index
    %28 = vector.load %arg7[%c0_14, %c0_15] : memref<16x256xf32, #tpu.memory_space<vmem>>, vector<16x256xf32>
    tpu.vector_store %arg7[%c0_14, %c0_15], %27 {strides = array<i32>} : memref<16x256xf32, #tpu.memory_space<vmem>>, vector<16x256xf32>,
    return
  }
  func.func @transform_0(%arg0: i32, %arg1: i32) -> (i32, i32) {
    %c0_i32 = arith.constant 0 : i32
    %c0_i32_0 = arith.constant 0 : i32
    return %arg0, %c0_i32 : i32, i32
  }
  func.func @transform_1(%arg0: i32, %arg1: i32) -> (i32, i32) {
    %c0_i32 = arith.constant 0 : i32
    %c0_i32_0 = arith.constant 0 : i32
    %c0_i32_1 = arith.constant 0 : i32
    return %c0_i32, %c0_i32_0 : i32, i32
  }
  func.func @transform_2(%arg0: i32, %arg1: i32) -> (i32, i32) {
    %c0_i32 = arith.constant 0 : i32
    %c0_i32_0 = arith.constant 0 : i32
    %c0_i32_1 = arith.constant 0 : i32
    return %c0_i32, %c0_i32_0 : i32, i32
  }
  func.func @transform_3(%arg0: i32, %arg1: i32) -> (i32, i32) {
    %c0_i32 = arith.constant 0 : i32
    %c0_i32_0 = arith.constant 0 : i32
    return %c0_i32, %arg1 : i32, i32
  }
  func.func @transform_4(%arg0: i32, %arg1: i32) -> (i32, i32) {
    %c0_i32 = arith.constant 0 : i32
    %c0_i32_0 = arith.constant 0 : i32
    return %c0_i32, %arg1 : i32, i32
  }
  func.func @transform_5(%arg0: i32, %arg1: i32) -> (i32, i32) {
    %c0_i32 = arith.constant 0 : i32
    return %arg0, %arg1 : i32, i32
  }
}

</mosaic_0001>

<bundles_post_ra>
// kernel: prenorm.1
= control target key start
LH: loop header
LB: loop body
LE: loop exit
PB: predicated region body
PF: predicated region fallthrough
CT: control target
= control target key end

     0   :  { %10 = vsyncpa [#allocation3], 0  ;;  %s426_s0 = inlined_call_operand.hbm [shape: f32[16,128], index: 0, kind: input, shape index: {}]   ;;  %s427_s1 = inlined_call_operand.vmem [shape: f32[1,128], index: 1, kind: input, shape index: {}]   ;;  %s428_s2 = inlined_call_operand.vmem [shape: f32[1,128], index: 2, kind: input, shape index: {}]   ;;  %s429_s3 = inlined_call_operand.hbm [shape: f32[128,256], index: 3, kind: input, shape index: {}]   ;;  %s430_s4 = inlined_call_operand.vmem [shape: f32[1,256], index: 4, kind: input, shape index: {}]   ;;  %s431_s5 = inlined_call_operand.hbm [shape: f32[16,256], index: 5, kind: output, shape index: {}]  }
   0x1   :  { %11 = vsyncpa [#allocation6], 0 }
   0x2   :  { %12 = vsyncpa [#allocation4], 0  ;;  %s17_s20 = sshll.u32 %s426_s0, 4  ;;  %s348_s21 = smov [#allocation2]   ;;  %s18_s20 = int_to_ptr.hbm [resolvable:$true] %s17_s20 }
   0x3   :  { %s19_s22 = sshll.u32 %s348_s21, 4  ;;  %s34_s25 = sshll.u32 %s429_s3, 4  ;;  %s20_s22 = int_to_ptr.vmem [resolvable:$true] %s19_s22  ;;  %s35_s25 = int_to_ptr.hbm [resolvable:$true] %s34_s25 }
   0x4   :  { %s349_s26 = smov 128   ;;  %s350_s27 = smov 8  }
   0x5   :  { %25 = dma.hbm_to_vmem [thread:$0]  %s18_s20, 256, %s20_s22, [#allocation3], %s349_s26, %s349_s26, %s350_s27  }
   0x6   :  { %s351_s28 = smov [#allocation5]   ;;  %s352_s30 = smov 256  }
   0x7   :  { %s36_s29 = sshll.u32 %s351_s28, 4  ;;  %s353_s6 = smov 16   ;;  %s37_s29 = int_to_ptr.vmem [resolvable:$true] %s36_s29 }
   0x8   :  { %42 = dma.hbm_to_vmem [thread:$0]  %s35_s25, 4096, %s37_s29, [#allocation6], %s352_s30, %s352_s30, %s353_s6  }
   0x9   :  { %342 = dma.done.wait [#allocation3], 256  }
   0xa   :  { %343 = vsyncadd [#allocation3], 4294967040 }
   0xb   :  { %344 = dma.done.wait [#allocation6], 4096  }
   0xc   :  { %345 = vsyncadd [#allocation6], 4294963200  ;;  %v54_v0 = vld [vmem:[#allocation2 + $0x8] sm:$0xff]  ;;  %v53_v1 = vld [vmem:[#allocation2] sm:$0xff]  ;;  %v354_v2 = vmov 128.0   ;;  %s208_s13 = sshll.u32 %s431_s5, 4  ;;  %s209_s13 = int_to_ptr.hbm [resolvable:$true] %s208_s13 }
   0xd   :  { %57 = vadd.xlane.f32.xlu0 %v54_v0  ;;  %264 = vrcp.f32 %v354_v2  ;;  %v144_v5 = vld [vmem:[#allocation5 + $0xf0] sm:$0xff]  ;;  %v145_v6 = vld [vmem:[#allocation5 + $0xf8] sm:$0xff]  ;;  %v142_v7 = vld [vmem:[#allocation5 + $0xe0] sm:$0xff] }
   0xe   :  { %222 = vmatpush.msra.mxu2 %v144_v5  ;;  %238 = vmatpush.msra.mxu3 %v145_v6  ;;  %v143_v8 = vld [vmem:[#allocation5 + $0xe8] sm:$0xff]  ;;  %v140_v21 = vld [vmem:[#allocation5 + $0xd0] sm:$0xff]  ;;  %v141_v22 = vld [vmem:[#allocation5 + $0xd8] sm:$0xff] }
   0xf   :  { %152 = vmatpush.msra.mxu0 %v144_v5  ;;  %175 = vmatpush.msra.mxu1 %v145_v6  ;;  %v138_v23 = vld [vmem:[#allocation5 + $0xc0] sm:$0xff]  ;;  %v139_v24 = vld [vmem:[#allocation5 + $0xc8] sm:$0xff]  ;;  %v136_v25 = vld [vmem:[#allocation5 + $0xb0] sm:$0xff] }
  0x10   :  { %223 = vmatpush.msra.mxu2 %v142_v7  ;;  %239 = vmatpush.msra.mxu3 %v143_v8  ;;  %v137_v26 = vld [vmem:[#allocation5 + $0xb8] sm:$0xff]  ;;  %v134_v27 = vld [vmem:[#allocation5 + $0xa0] sm:$0xff]  ;;  %v135_v28 = vld [vmem:[#allocation5 + $0xa8] sm:$0xff] }
  0x11   :  { %153 = vmatpush.msra.mxu0 %v142_v7  ;;  %176 = vmatpush.msra.mxu1 %v143_v8  ;;  %v132_v29 = vld [vmem:[#allocation5 + $0x90] sm:$0xff]  ;;  %v133_v30 = vld [vmem:[#allocation5 + $0x98] sm:$0xff]  ;;  %v130_v31 = vld [vmem:[#allocation5 + $0x80] sm:$0xff] }
  0x12   :  { %224 = vmatpush.msra.mxu2 %v140_v21  ;;  %240 = vmatpush.msra.mxu3 %v141_v22  ;;  %v131_v32 = vld [vmem:[#allocation5 + $0x88] sm:$0xff]  ;;  %v128_v33 = vld [vmem:[#allocation5 + $0x70] sm:$0xff]  ;;  %v129_v34 = vld [vmem:[#allocation5 + $0x78] sm:$0xff] }
  0x13   :  { %v265_v3 = vpop.eup %264  ;;  %154 = vmatpush.msra.mxu0 %v140_v21  ;;  %177 = vmatpush.msra.mxu1 %v141_v22  ;;  %v126_v35 = vld [vmem:[#allocation5 + $0x60] sm:$0xff]  ;;  %v127_v36 = vld [vmem:[#allocation5 + $0x68] sm:$0xff]  ;;  %v124_v37 = vld [vmem:[#allocation5 + $0x50] sm:$0xff] }
  0x14   :  { %v60_v4 = vmul.f32 128.0, %v265_v3  ;;  %vm64_vm0 = vweird.f32 %v265_v3  ;;  %225 = vmatpush.msra.mxu2 %v138_v23  ;;  %241 = vmatpush.msra.mxu3 %v139_v24  ;;  %v125_v38 = vld [vmem:[#allocation5 + $0x58] sm:$0xff]  ;;  %v122_v39 = vld [vmem:[#allocation5 + $0x40] sm:$0xff]  ;;  %v123_v40 = vld [vmem:[#allocation5 + $0x48] sm:$0xff] }
  0x15   :  { %55 = vadd.xlane.f32.xlu0 %v53_v1  ;;  %155 = vmatpush.msra.mxu0 %v138_v23  ;;  %v120_v41 = vld [vmem:[#allocation5 + $0x30] sm:$0xff]  ;;  %v121_v42 = vld [vmem:[#allocation5 + $0x38] sm:$0xff]  ;;  %v118_v43 = vld [vmem:[#allocation5 + $0x20] sm:$0xff] }
  0x16   :  { %v61_v9 = vsub.f32 1.0, %v60_v4  ;;  %178 = vmatpush.msra.mxu1 %v139_v24  ;;  %226 = vmatpush.msra.mxu2 %v136_v25  ;;  %v119_v44 = vld [vmem:[#allocation5 + $0x28] sm:$0xff]  ;;  %v116_v45 = vld [vmem:[#allocation5 + $0x10] sm:$0xff]  ;;  %v117_v46 = vld [vmem:[#allocation5 + $0x18] sm:$0xff] }
  0x17   :  { %242 = vmatpush.msra.mxu3 %v137_v26  ;;  %156 = vmatpush.msra.mxu0 %v136_v25  ;;  %v114_v47 = vld [vmem:[#allocation5] sm:$0xff]  ;;  %v115_v48 = vld [vmem:[#allocation5 + $0x8] sm:$0xff]  ;;  %v262_v63 = vld [vmem:[%s427_s1] ss:$0 sm:$0xff] }
  0x18   :  { %v62_v10 = vmul.f32 %v265_v3, %v61_v9  ;;  %179 = vmatpush.msra.mxu1 %v137_v26  ;;  %227 = vmatpush.msra.mxu2 %v134_v27 }
  0x19   :  { %243 = vmatpush.msra.mxu3 %v135_v28  ;;  %157 = vmatpush.msra.mxu0 %v134_v27 }
  0x1a   :  { %v63_v11 = vadd.f32 %v265_v3, %v62_v10  ;;  %180 = vmatpush.msra.mxu1 %v135_v28  ;;  %228 = vmatpush.msra.mxu2 %v132_v29 }
  0x1b   :  { %244 = vmatpush.msra.mxu3 %v133_v30  ;;  %158 = vmatpush.msra.mxu0 %v132_v29 }
  0x1c   :  { %v395_v12 = vsel %vm64_vm0, %v265_v3, %v63_v11  ;;  %181 = vmatpush.msra.mxu1 %v133_v30  ;;  %229 = vmatpush.msra.mxu2 %v130_v31  ;;  %v263_v3 = vld [vmem:[%s428_s2] ss:$0 sm:$0xff]  ;;  %s355_s2 = smov [#allocation7]  }
  0x1d   :  { %245 = vmatpush.msra.mxu3 %v131_v32  ;;  %159 = vmatpush.msra.mxu0 %v130_v31  ;;  %s206_s10 = sshll.u32 %s355_s2, 4  ;;  %s207_s10 = int_to_ptr.vmem [resolvable:$true] %s206_s10 }
  0x1e   :  { %182 = vmatpush.msra.mxu1 %v131_v32  ;;  %230 = vmatpush.msra.mxu2 %v128_v33 }
  0x1f   :  { %246 = vmatpush.msra.mxu3 %v129_v34  ;;  %160 = vmatpush.msra.mxu0 %v128_v33 }
  0x20   :  { %183 = vmatpush.msra.mxu1 %v129_v34  ;;  %231 = vmatpush.msra.mxu2 %v126_v35 }
  0x21   :  { %247 = vmatpush.msra.mxu3 %v127_v36  ;;  %161 = vmatpush.msra.mxu0 %v126_v35 }
  0x22   :  { %184 = vmatpush.msra.mxu1 %v127_v36  ;;  %232 = vmatpush.msra.mxu2 %v124_v37 }
  0x23   :  { %248 = vmatpush.msra.mxu3 %v125_v38  ;;  %162 = vmatpush.msra.mxu0 %v124_v37 }
  0x24   :  { %185 = vmatpush.msra.mxu1 %v125_v38  ;;  %233 = vmatpush.msra.mxu2 %v122_v39 }
  0x25   :  { %249 = vmatpush.msra.mxu3 %v123_v40  ;;  %163 = vmatpush.msra.mxu0 %v122_v39 }
  0x26   :  { %186 = vmatpush.msra.mxu1 %v123_v40  ;;  %234 = vmatpush.msra.mxu2 %v120_v41 }
  0x27   :  { %250 = vmatpush.msra.mxu3 %v121_v42  ;;  %164 = vmatpush.msra.mxu0 %v120_v41 }
  0x28   :  { %187 = vmatpush.msra.mxu1 %v121_v42  ;;  %235 = vmatpush.msra.mxu2 %v118_v43 }
  0x29   :  { %251 = vmatpush.msra.mxu3 %v119_v44  ;;  %165 = vmatpush.msra.mxu0 %v118_v43 }
  0x2a   :  { %188 = vmatpush.msra.mxu1 %v119_v44  ;;  %236 = vmatpush.msra.mxu2 %v116_v45 }
  0x2b   :  { %252 = vmatpush.msra.mxu3 %v117_v46  ;;  %166 = vmatpush.msra.mxu0 %v116_v45 }
  0x2c   :  { %189 = vmatpush.msra.mxu1 %v117_v46  ;;  %237 = vmatpush.msra.mxu2 %v114_v47 }
  0x2d   :  { %253 = vmatpush.msra.mxu3 %v115_v48  ;;  %167 = vmatpush.msra.mxu0 %v114_v47 }
  0x2e   :  { %190 = vmatpush.msra.mxu1 %v115_v48 }
  0x80   :  { %v58_v13 = vpop.xlane.xlu0 %57 }
  0x81   :  { %v67_v14 = vmul.f32 %v395_v12, %v58_v13  ;;  %v146_v13 = vld [vmem:[%s430_s4] sm:$0x3] }
  0x83   :  { %v398_v15 = vsub.f32 %v54_v0, %v67_v14  ;;  %v148_v14 = vperm.slane %v146_v13, 0 }
  0x85   :  { %v71_v16 = vmul.f32 %v398_v15, %v398_v15 }
  0x87   :  { %74 = vadd.xlane.f32.xlu1 %v71_v16 }
  0x88   :  { %v56_v17 = vpop.xlane.xlu0 %55 }
  0x89   :  { %v66_v18 = vmul.f32 %v395_v12, %v56_v17 }
  0x8b   :  { %v403_v19 = vsub.f32 %v53_v1, %v66_v18 }
  0x8d   :  { %v70_v20 = vmul.f32 %v403_v19, %v403_v19 }
  0x8f   :  { %72 = vadd.xlane.f32.xlu1 %v70_v20 }
  0xfa   :  { %v75_v49 = vpop.xlane.xlu1 %74 }
  0xfb   :  { %v77_v50 = vmul.f32 %v75_v49, %v395_v12 }
  0xfd   :  { %v79_v51 = vadd.f32 1e-05, %v77_v50 }
  0xff   :  { %266 = vrsqrt.f32 %v79_v51  ;;  %vm96_vm2 = vweird.f32 %v79_v51 }
 0x102   :  { %v73_v52 = vpop.xlane.xlu1 %72 }
 0x103   :  { %v76_v53 = vmul.f32 %v73_v52, %v395_v12 }
 0x105   :  { %v267_v54 = vpop.eup %266  ;;  %v78_v55 = vadd.f32 1e-05, %v76_v53 }
 0x106   :  { %v91_v56 = vmul.f32 %v267_v54, %v79_v51  ;;  %vm97_vm1 = vweird.f32 %v267_v54 }
 0x107   :  { %268 = vrsqrt.f32 %v78_v55  ;;  %vm98_vm3 = vmor %vm96_vm2, %vm97_vm1  ;;  %vm86_vm5 = vweird.f32 %v78_v55 }
 0x108   :  { %v92_v57 = vmul.f32 %v267_v54, %v91_v56 }
 0x10a   :  { %v93_v58 = vmul.f32 0.5, %v92_v57 }
 0x10c   :  { %v94_v59 = vsub.f32 1.5, %v93_v58 }
 0x10d   :  { %v269_v60 = vpop.eup %268 }
 0x10e   :  { %v95_v61 = vmul.f32 %v267_v54, %v94_v59  ;;  %v81_v62 = vmul.f32 %v269_v60, %v78_v55  ;;  %vm87_vm4 = vweird.f32 %v269_v60 }
 0x10f   :  { %vm88_vm6 = vmor %vm86_vm5, %vm87_vm4 }
 0x110   :  { %v82_v0 = vmul.f32 %v269_v60, %v81_v62  ;;  %v99_v1 = vsel %vm98_vm3, %v267_v54, %v95_v61 }
 0x111   :  { %v101_v2 = vmul.f32 %v99_v1, %v398_v15  ;;  %v149_v15 = vperm.slane %v146_v13, 1 }
 0x112   :  { %v83_v4 = vmul.f32 0.5, %v82_v0 }
 0x113   :  { %v107_v5 = vmul.f32 %v262_v63, %v101_v2 }
 0x114   :  { %v84_v6 = vsub.f32 1.5, %v83_v4 }
 0x115   :  { %v113_v7 = vadd.f32 %v263_v3, %v107_v5 }
 0x116   :  { %v85_v8 = vmul.f32 %v269_v60, %v84_v6 }
 0x117   :  { %171 = vmatmul.f32.vlgmr.msra.gmra.mxu2 %v113_v7  ;;  %194 = vmatmul.f32.vlgmr.msra.gmra.mxu3 %v113_v7 }
 0x118   :  { %v89_v9 = vsel %vm88_vm6, %v269_v60, %v85_v8 }
 0x119   :  { %v100_v10 = vmul.f32 %v89_v9, %v403_v19 }
 0x11b   :  { %v106_v11 = vmul.f32 %v262_v63, %v100_v10 }
 0x11d   :  { %v112_v12 = vadd.f32 %v263_v3, %v106_v11 }
 0x11f   :  { %168 = vmatmul.f32.vlgmr.msra.gmra.mxu0 %v112_v12  ;;  %191 = vmatmul.f32.vlgmr.msra.gmra.mxu1 %v112_v12 }
 0x19a   :  { %v172_v16 = vpop.f32.mrf.mxu2  ;;  %v195_v17 = vpop.f32.mrf.mxu3 }
 0x19b   :  { %v173_v18 = vadd.f32 %v172_v16, %v148_v14  ;;  %v196_v20 = vadd.f32 %v195_v17, %v149_v15 }
 0x19c   :  { %v169_v19 = vpop.f32.mrf.mxu0  ;;  %v192_v21 = vpop.f32.mrf.mxu1 }
 0x19d   :  { %200 = vst [vmem:[#allocation7 + $0x10] sm:$0xff] %v173_v18  ;;  %v170_v22 = vadd.f32 %v169_v19, %v148_v14  ;;  %v193_v23 = vadd.f32 %v192_v21, %v149_v15 }
 0x19e   :  { %201 = vst [vmem:[#allocation7 + $0x18] sm:$0xff] %v196_v20 }
 0x19f   :  { %198 = vst [vmem:[#allocation7] sm:$0xff] %v170_v22 }
 0x1a0   :  { %199 = vst [vmem:[#allocation7 + $0x8] sm:$0xff] %v193_v23 }
 0x1a1   :  { %214 = dma.vmem_to_hbm [thread:$0]  %s207_s10, 512, %s209_s13, [#allocation4], %s352_s30, %s352_s30, %s353_s6  }
 0x1a2   :  { %346 = dma.done.wait [#allocation4], 512  }
 0x1a3   :  { %347 = vsyncadd [#allocation4], 4294966784 }
 0x1a4   :  { %219 = vsyncpa [#allocation3], 1 }
 0x1a5   :  { %220 = vsyncpa [#allocation6], 1 }
 0x1a6   :  { %221 = vsyncpa [#allocation4], 1 }

</bundles_post_ra>
